<compile_context>
chip_gen: v5e
topology: v5e:2x2
jax: 0.10.0
libtpu: 0.0.40
codegen_flags: <defaults>
</compile_context>

<pallas_src>
import jax
import jax.numpy as jnp
from jax.experimental import pallas as pl
from jax.experimental.pallas import tpu as pltpu

FILTER_SIZES = (1, 2, 3)


def _round_up(x, m):
    return ((x + m - 1) // m) * m


def cnn_layer_kernel(x_ref, w_ref, b_ref, out_ref):
    """One batch-block per grid step.

    x_ref  : (TB, T, D)      TB input sequences
    w_ref  : (D, 6*Fp)       all conv taps stacked along the output dim in
                             (enc0 tap0, enc1 tap0, enc1 tap1, enc2 tap0/1/2)
                             order; filters zero-padded to Fp (lane-dense)
    b_ref  : (3, Fp)         one bias row per encoder, zero-padded
    out_ref: (TB, 3*Fp)      max-pooled relu(conv), encoders concatenated
    """
    x = x_ref[...]                               # (TB, T, D)
    TB, T, D = x.shape
    b = b_ref[...]                               # (3, Fp)
    Fp = b.shape[1]

    # Single MXU matmul for every tap of every encoder at once.
    x2 = x.reshape(TB * T, D)
    y = jnp.dot(x2, w_ref[...], preferred_element_type=jnp.float32)
    y3 = y.reshape(TB, T, y.shape[1])            # (TB, T, 6*Fp)

    outs = []
    col = 0
    for enc_idx, fs in enumerate(FILTER_SIZES):
        tout = T - fs + 1
        # conv over time: out[b, t, f] = bias[f] + sum_k x[b, t+k, :] @ w_k[:, f]
        acc = y3[:, 0:tout, col:col + Fp]
        col += Fp
        for k in range(1, fs):
            acc = acc + y3[:, k:k + tout, col:col + Fp]
            col += Fp
        acc = jnp.maximum(acc + b[enc_idx][None, None, :], 0.0)   # +bias, ReLU
        outs.append(jnp.max(acc, axis=1))                         # time max-pool
    out_ref[...] = jnp.concatenate(outs, axis=1)                  # (TB, 3*Fp)


def _pad_time_like_torch(x):
    # while inputs.size(2) < 3: inputs = cat((inputs, zeros_like(inputs)), 2)
    while x.shape[2] < 3:
        x = jnp.concatenate([x, jnp.zeros_like(x)], axis=2)
    return x


def cnn_layer_forward(inputs, w_all, b, num_filters):
    """inputs: (B, 1, T, D) f32.  Returns (B, 3*num_filters), matching
    CnnLayer.forward in eval mode (dropout = identity)."""
    inputs = _pad_time_like_torch(inputs)
    B, _, T, D = inputs.shape
    x = inputs[:, 0, :, :]                       # (B, T, D)
    Fp = b.shape[1]
    CT = w_all.shape[1]                          # 6 * Fp

    # Batch-block size: aim for >=128 matmul rows (TB*T), multiple of 8,
    # without overshooting the (8-padded) batch.
    TB = max(8, _round_up(-(-128 // T), 8))
    TB = min(TB, _round_up(B, 8))
    B_pad = _round_up(B, TB)
    if B_pad != B:
        x = jnp.pad(x, ((0, B_pad - B), (0, 0), (0, 0)))

    flops = 2 * B_pad * T * D * CT + 4 * B_pad * T * (3 * Fp)
    bytes_accessed = 4 * (B_pad * T * D + D * CT + 3 * Fp + B_pad * 3 * Fp)

    out = pl.pallas_call(
        cnn_layer_kernel,
        out_shape=jax.ShapeDtypeStruct((B_pad, 3 * Fp), jnp.float32),
        grid_spec=pltpu.PrefetchScalarGridSpec(
            num_scalar_prefetch=0,
            grid=(B_pad // TB,),
            in_specs=[
                pl.BlockSpec((TB, T, D), lambda i: (i, 0, 0)),   # batch block
                pl.BlockSpec((D, CT), lambda i: (0, 0)),         # resident W
                pl.BlockSpec((3, Fp), lambda i: (0, 0)),         # resident bias
            ],
            out_specs=pl.BlockSpec((TB, 3 * Fp), lambda i: (i, 0)),
        ),
        compiler_params=pltpu.CompilerParams(
            dimension_semantics=("parallel",)),
        cost_estimate=pl.CostEstimate(
            flops=flops, transcendentals=0, bytes_accessed=bytes_accessed),
    )(x, w_all, b)

    # Drop batch/filter padding, flatten -> torch.cat(enc_outs, 1) layout.
    # TODO(synk): nn.Dropout(p=0.5) is identity in eval mode; training-mode
    # stochastic dropout is not implemented in-kernel.
    out = out[:B].reshape(B, 3, Fp)[:, :, :num_filters]
    return out.reshape(B, 3 * num_filters)


def prepare_params(torch_weights, torch_biases, f_pad=128):
    """torch_weights[i]: (F, 1, fs_i, D); torch_biases[i]: (F,).
    Returns W_all of shape (D, sum(fs)*Fp) -- all encoder taps stacked along
    the output dim -- and b of shape (3, Fp), both zero-padded to Fp filters."""
    F = torch_biases[0].shape[0]
    Fp = max(f_pad, ((F + 127) // 128) * 128)
    cols = []
    for w in torch_weights:
        fs = w.shape[2]
        for k in range(fs):
            wk = jnp.transpose(w[:, 0, k, :], (1, 0))            # (D, F)
            cols.append(jnp.pad(wk, ((0, 0), (0, Fp - F))))
    w_all = jnp.concatenate(cols, axis=1)                        # (D, 6*Fp)
    b = jnp.stack([jnp.pad(bi, (0, Fp - F)) for bi in torch_biases], axis=0)
    return w_all, b


def cnn_layer_ref(inputs, torch_weights, torch_biases):
    """Pure-JAX reference of CnnLayer.forward (eval mode)."""
    inputs = _pad_time_like_torch(inputs)
    x = inputs[:, 0]                  # (B, T, D)
    T = x.shape[1]
    outs = []
    for w, bias in zip(torch_weights, torch_biases):
        fs = w.shape[2]
        tout = T - fs + 1
        conv = sum(jnp.einsum('btd,fd->btf', x[:, k:k + tout], w[:, 0, k])
                   for k in range(fs)) + bias[None, None, :]
        conv = jnp.maximum(conv, 0.0)
        outs.append(jnp.max(conv, axis=1))
    return jnp.concatenate(outs, axis=1)


if __name__ == "__main__":
    B, T, D = 2, 8, 32            # batch, seq_len, mem_dim
    num_filters = 50

    key = jax.random.PRNGKey(0)
    kx, kx2, *kw = jax.random.split(key, 2 + 2 * len(FILTER_SIZES))

    inputs = jax.random.normal(kx, (B, 1, T, D), dtype=jnp.float32)

    torch_weights, torch_biases = [], []
    for i, fs in enumerate(FILTER_SIZES):
        torch_weights.append(
            jax.random.normal(kw[2 * i], (num_filters, 1, fs, D),
                              dtype=jnp.float32) * 0.1)
        torch_biases.append(
            jax.random.normal(kw[2 * i + 1], (num_filters,),
                              dtype=jnp.float32) * 0.1)

    w_all, b = prepare_params(torch_weights, torch_biases)

    out = jax.block_until_ready(
        cnn_layer_forward(inputs, w_all, b, num_filters))
    ref = cnn_layer_ref(inputs, torch_weights, torch_biases)
    assert out.shape == (B, 3 * num_filters)
    assert jnp.allclose(out, ref, atol=1e-4, rtol=1e-4)

    # Exercise the `while inputs.size(2) < 3` zero-padding path (T=2 -> 4).
    inputs_short = jax.random.normal(kx2, (B, 1, 2, D), dtype=jnp.float32)
    out_short = jax.block_until_ready(
        cnn_layer_forward(inputs_short, w_all, b, num_filters))
    ref_short = cnn_layer_ref(inputs_short, torch_weights, torch_biases)
    assert out_short.shape == (B, 3 * num_filters)
    assert jnp.allclose(out_short, ref_short, atol=1e-4, rtol=1e-4)

    print("KERNEL_OK")
</pallas_src>

<mosaic_0001>
module attributes {stable_mosaic.version = 11 : i64} {
  func.func @cnn_layer_kernel(%arg0: i32, %arg1: memref<8x8x32xf32, #tpu.memory_space<vmem>>, %arg2: memref<32x768xf32, #tpu.memory_space<vmem>>, %arg3: memref<3x128xf32, #tpu.memory_space<vmem>>, %arg4: memref<8x384xf32, #tpu.memory_space<vmem>>) attributes {dimension_semantics = [#tpu.dimension_semantics<parallel>], iteration_bounds = array<i64: 1>, scalar_prefetch = 0 : i64, scratch_operands = 0 : i64, tpu.core_type = #tpu.core_type<tc>, window_params = [{transform_indices = @transform_0, window_bounds = array<i64: 8, 8, 32>}, {pipeline_mode = #tpu.pipeline_mode<synchronous>, transform_indices = @transform_1, window_bounds = array<i64: 32, 768>}, {pipeline_mode = #tpu.pipeline_mode<synchronous>, transform_indices = @transform_2, window_bounds = array<i64: 3, 128>}, {transform_indices = @transform_3, window_bounds = array<i64: 8, 384>}]} {
    %c0 = arith.constant 0 : index
    %c0_0 = arith.constant 0 : index
    %c0_1 = arith.constant 0 : index
    %0 = vector.load %arg1[%c0, %c0_0, %c0_1] : memref<8x8x32xf32, #tpu.memory_space<vmem>>, vector<8x8x32xf32>
    %c0_2 = arith.constant 0 : index
    %c0_3 = arith.constant 0 : index
    %1 = vector.load %arg3[%c0_2, %c0_3] : memref<3x128xf32, #tpu.memory_space<vmem>>, vector<3x128xf32>
    %2 = vector.shape_cast %0 : vector<8x8x32xf32> to vector<64x32xf32>
    %c0_4 = arith.constant 0 : index
    %c0_5 = arith.constant 0 : index
    %3 = vector.load %arg2[%c0_4, %c0_5] : memref<32x768xf32, #tpu.memory_space<vmem>>, vector<32x768xf32>
    %cst = arith.constant dense<0.000000e+00> : vector<64x768xf32>
    %4 = tpu.matmul %2, %3, %cst {dimension_numbers = #tpu.dot_dimension_numbers<[1], [0], [0], [1], [0, 0, 1, 1], [], []>} : vector<64x32xf32>, vector<32x768xf32>, vector<64x768xf32> -> vector<64x768xf32>
    %5 = vector.shape_cast %4 : vector<64x768xf32> to vector<8x8x768xf32>
    %6 = vector.extract_strided_slice %5 {offsets = [0, 0, 0], sizes = [8, 8, 128], strides = [1, 1, 1]} : vector<8x8x768xf32> to vector<8x8x128xf32>
    %7 = vector.extract_strided_slice %1 {offsets = [0, 0], sizes = [1, 128], strides = [1, 1]} : vector<3x128xf32> to vector<1x128xf32>
    %8 = vector.shape_cast %7 : vector<1x128xf32> to vector<128xf32>
    %9 = vector.shape_cast %8 : vector<128xf32> to vector<1x1x128xf32>
    %10 = vector.broadcast %9 : vector<1x1x128xf32> to vector<8x8x128xf32>
    %11 = arith.addf %6, %10 : vector<8x8x128xf32>
    %cst_6 = arith.constant 0.000000e+00 : f32
    %12 = vector.broadcast %cst_6 : f32 to vector<8x8x128xf32>
    %13 = arith.maximumf %11, %12 : vector<8x8x128xf32>
    %cst_7 = arith.constant dense<0xFF800000> : vector<8x128xf32>
    %14 = vector.multi_reduction <maximumf>, %13, %cst_7 [1] : vector<8x8x128xf32> to vector<8x128xf32>
    %15 = vector.extract_strided_slice %5 {offsets = [0, 0, 128], sizes = [8, 7, 128], strides = [1, 1, 1]} : vector<8x8x768xf32> to vector<8x7x128xf32>
    %16 = vector.extract_strided_slice %5 {offsets = [0, 1, 256], sizes = [8, 7, 128], strides = [1, 1, 1]} : vector<8x8x768xf32> to vector<8x7x128xf32>
    %17 = arith.addf %15, %16 : vector<8x7x128xf32>
    %18 = vector.extract_strided_slice %1 {offsets = [1, 0], sizes = [1, 128], strides = [1, 1]} : vector<3x128xf32> to vector<1x128xf32>
    %19 = vector.shape_cast %18 : vector<1x128xf32> to vector<128xf32>
    %20 = vector.shape_cast %19 : vector<128xf32> to vector<1x1x128xf32>
    %21 = vector.broadcast %20 : vector<1x1x128xf32> to vector<8x7x128xf32>
    %22 = arith.addf %17, %21 : vector<8x7x128xf32>
    %cst_8 = arith.constant 0.000000e+00 : f32
    %23 = vector.broadcast %cst_8 : f32 to vector<8x7x128xf32>
    %24 = arith.maximumf %22, %23 : vector<8x7x128xf32>
    %cst_9 = arith.constant dense<0xFF800000> : vector<8x128xf32>
    %25 = vector.multi_reduction <maximumf>, %24, %cst_9 [1] : vector<8x7x128xf32> to vector<8x128xf32>
    %26 = vector.extract_strided_slice %5 {offsets = [0, 0, 384], sizes = [8, 6, 128], strides = [1, 1, 1]} : vector<8x8x768xf32> to vector<8x6x128xf32>
    %27 = vector.extract_strided_slice %5 {offsets = [0, 1, 512], sizes = [8, 6, 128], strides = [1, 1, 1]} : vector<8x8x768xf32> to vector<8x6x128xf32>
    %28 = arith.addf %26, %27 : vector<8x6x128xf32>
    %29 = vector.extract_strided_slice %5 {offsets = [0, 2, 640], sizes = [8, 6, 128], strides = [1, 1, 1]} : vector<8x8x768xf32> to vector<8x6x128xf32>
    %30 = arith.addf %28, %29 : vector<8x6x128xf32>
    %31 = vector.extract_strided_slice %1 {offsets = [2, 0], sizes = [1, 128], strides = [1, 1]} : vector<3x128xf32> to vector<1x128xf32>
    %32 = vector.shape_cast %31 : vector<1x128xf32> to vector<128xf32>
    %33 = vector.shape_cast %32 : vector<128xf32> to vector<1x1x128xf32>
    %34 = vector.broadcast %33 : vector<1x1x128xf32> to vector<8x6x128xf32>
    %35 = arith.addf %30, %34 : vector<8x6x128xf32>
    %cst_10 = arith.constant 0.000000e+00 : f32
    %36 = vector.broadcast %cst_10 : f32 to vector<8x6x128xf32>
    %37 = arith.maximumf %35, %36 : vector<8x6x128xf32>
    %cst_11 = arith.constant dense<0xFF800000> : vector<8x128xf32>
    %38 = vector.multi_reduction <maximumf>, %37, %cst_11 [1] : vector<8x6x128xf32> to vector<8x128xf32>
    %39 = tpu.concatenate %14, %25, %38 in 1 : vector<8x128xf32>, vector<8x128xf32>, vector<8x128xf32> -> vector<8x384xf32>
    %c0_12 = arith.constant 0 : index
    %c0_13 = arith.constant 0 : index
    %40 = vector.load %arg4[%c0_12, %c0_13] : memref<8x384xf32, #tpu.memory_space<vmem>>, vector<8x384xf32>
    tpu.vector_store %arg4[%c0_12, %c0_13], %39 {strides = array<i32>} : memref<8x384xf32, #tpu.memory_space<vmem>>, vector<8x384xf32>,
    return
  }
  func.func @transform_0(%arg0: i32) -> (i32, i32, i32) {
    %c0_i32 = arith.constant 0 : i32
    %c0_i32_0 = arith.constant 0 : i32
    %c0_i32_1 = arith.constant 0 : i32
    return %arg0, %c0_i32, %c0_i32_0 : i32, i32, i32
  }
  func.func @transform_1(%arg0: i32) -> (i32, i32) {
    %c0_i32 = arith.constant 0 : i32
    %c0_i32_0 = arith.constant 0 : i32
    %c0_i32_1 = arith.constant 0 : i32
    return %c0_i32, %c0_i32_0 : i32, i32
  }
  func.func @transform_2(%arg0: i32) -> (i32, i32) {
    %c0_i32 = arith.constant 0 : i32
    %c0_i32_0 = arith.constant 0 : i32
    %c0_i32_1 = arith.constant 0 : i32
    return %c0_i32, %c0_i32_0 : i32, i32
  }
  func.func @transform_3(%arg0: i32) -> (i32, i32) {
    %c0_i32 = arith.constant 0 : i32
    %c0_i32_0 = arith.constant 0 : i32
    return %arg0, %c0_i32 : i32, i32
  }
}

</mosaic_0001>

<bundles_post_ra>
// kernel: tpu_custom_call.1
= control target key start
LH: loop header
LB: loop body
LE: loop exit
PB: predicated region body
PF: predicated region fallthrough
CT: control target
= control target key end

     0   :  { %8 = vsyncpa [#allocation3], 0  ;;  %s1105_s0 = inlined_call_operand.hbm [shape: f32[8,8,32], index: 0, kind: input, shape index: {}]   ;;  %s1106_s1 = inlined_call_operand.hbm [shape: f32[32,768], index: 1, kind: input, shape index: {}]   ;;  %s1107_s2 = inlined_call_operand.hbm [shape: f32[3,128], index: 2, kind: input, shape index: {}]   ;;  %s1108_s3 = inlined_call_operand.hbm [shape: f32[8,384], index: 3, kind: output, shape index: {}]  }
   0x1   :  { %9 = vsyncpa [#allocation6], 0  ;;  %s28_s14 = sshll.u32 %s1106_s1, 4  ;;  %s29_s14 = int_to_ptr.hbm [resolvable:$true] %s28_s14 }
   0x2   :  { %10 = vsyncpa [#allocation4], 0  ;;  %s915_s15 = smov [#allocation5]   ;;  %s15_s19 = sshll.u32 %s1105_s0, 4  ;;  %s16_s19 = int_to_ptr.hbm [resolvable:$true] %s15_s19 }
   0x3   :  { %s30_s16 = sshll.u32 %s915_s15, 4  ;;  %s916_s20 = smov 768   ;;  %s31_s16 = int_to_ptr.vmem [resolvable:$true] %s30_s16 }
   0x4   :  { %s917_s21 = smov 48   ;;  %s918_s22 = smov [#allocation2]  }
   0x5   :  { %36 = dma.hbm_to_vmem [thread:$0]  %s29_s14, 3072, %s31_s16, [#allocation6], %s916_s20, %s916_s20, %s917_s21  }
   0x6   :  { %s17_s23 = sshll.u32 %s918_s22, 4  ;;  %s919_s24 = smov 128   ;;  %s18_s23 = int_to_ptr.vmem [resolvable:$true] %s17_s23 }
   0x7   :  { %s920_s25 = smov 8   ;;  %s42_s27 = sshll.u32 %s1107_s2, 4  ;;  %s43_s27 = int_to_ptr.hbm [resolvable:$true] %s42_s27 }
   0x8   :  { %23 = dma.hbm_to_vmem [thread:$0]  %s16_s19, 1024, %s18_s23, [#allocation3], %s919_s24, %s919_s24, %s920_s25  }
   0x9   :  { %s921_s28 = smov [#allocation7]  }
   0xa   :  { %s44_s29 = sshll.u32 %s921_s28, 4  ;;  %s45_s29 = int_to_ptr.vmem [resolvable:$true] %s44_s29 }
   0xb   :  { %47 = dma.hbm_to_vmem [thread:$0]  %s43_s27, 64, %s45_s29, [#allocation6]  }
   0xc   :  { %909 = dma.done.wait [#allocation3], 1024  }
   0xd   :  { %910 = vsyncadd [#allocation3], 4294966272 }
   0xe   :  { %911 = dma.done.wait [#allocation6], 3136  }
   0xf   :  { %912 = vsyncadd [#allocation6], 4294964160  ;;  %v87_v0 = vld [vmem:[#allocation5 + $0x90] sm:$0xff]  ;;  %v88_v1 = vld [vmem:[#allocation5 + $0x98] sm:$0xff]  ;;  %vm93_vm0 = vcmask 261120   ;;  %vm681_vm1 = vcmask 1041409  }
  0x10   :  { %v81_v2 = vld [vmem:[#allocation5 + $0x60] sm:$0xff]  ;;  %130 = vmatpush.msra.mxu0 %v87_v0  ;;  %797 = vmatpush.msra.mxu2 %v87_v0  ;;  %v82_v3 = vld [vmem:[#allocation5 + $0x68] sm:$0xff]  ;;  %v75_v4 = vld [vmem:[#allocation5 + $0x30] sm:$0xff]  ;;  %vm683_vm2 = vcmask 1042434   ;;  %vm685_vm3 = vcmask 1043459   ;;  %vm687_vm4 = vcmask 1044484  }
  0x11   :  { %801 = vmatpush.msra.mxu3 %v88_v1  ;;  %171 = vmatpush.msra.mxu1 %v88_v1  ;;  %v76_v5 = vld [vmem:[#allocation5 + $0x38] sm:$0xff]  ;;  %v69_v6 = vld [vmem:[#allocation5] sm:$0xff]  ;;  %v70_v7 = vld [vmem:[#allocation5 + $0x8] sm:$0xff]  ;;  %vm689_vm5 = vcmask 1045509   ;;  %vm691_vm6 = vcmask 1046534   ;;  %vm478_vm7 = vcmask 1046528  }
  0x12   :  { %131 = vmatpush.msra.mxu0 %v81_v2  ;;  %798 = vmatpush.msra.mxu2 %v81_v2  ;;  %v952_v8 = vld [vmem:[#allocation2] sm:$0xff]  ;;  %v90_v11 = vld [vmem:[#allocation5 + $0xa8] sm:$0xff]  ;;  %v91_v12 = vld [vmem:[#allocation5 + $0xb0] sm:$0xff]  ;;  %vm616_vm8 = vcmask 1045504   ;;  %vm693_vm9 = vcmask 1047559   ;;  %s922_s0 = smov [#allocation8]  }
  0x13   :  { %802 = vmatpush.msra.mxu3 %v82_v3  ;;  %172 = vmatpush.msra.mxu1 %v82_v3  ;;  %v954_v9 = vld [vmem:[#allocation2 + $0x20] sm:$0xff]  ;;  %v83_v13 = vld [vmem:[#allocation5 + $0x70] sm:$0xff]  ;;  %v92_v14 = vld [vmem:[#allocation5 + $0xb8] sm:$0xff]  ;;  %s736_s2 = sshll.u32 %s922_s0, 4  ;;  %s738_s5 = sshll.u32 %s1108_s3, 4  ;;  %s737_s2 = int_to_ptr.vmem [resolvable:$true] %s736_s2  ;;  %s739_s5 = int_to_ptr.hbm [resolvable:$true] %s738_s5 }
  0x14   :  { %132 = vmatpush.msra.mxu0 %v75_v4  ;;  %799 = vmatpush.msra.mxu2 %v75_v4  ;;  %v89_v10 = vld [vmem:[#allocation5 + $0xa0] sm:$0xff]  ;;  %v84_v15 = vld [vmem:[#allocation5 + $0x78] sm:$0xff]  ;;  %v86_v18 = vld [vmem:[#allocation5 + $0x88] sm:$0xff] }
  0x15   :  { %803 = vmatpush.msra.mxu3 %v76_v5  ;;  %173 = vmatpush.msra.mxu1 %v76_v5  ;;  %v85_v16 = vld [vmem:[#allocation5 + $0x80] sm:$0xff]  ;;  %v78_v19 = vld [vmem:[#allocation5 + $0x48] sm:$0xff]  ;;  %v71_v21 = vld [vmem:[#allocation5 + $0x10] sm:$0xff] }
  0x16   :  { %133 = vmatpush.msra.mxu0 %v69_v6  ;;  %800 = vmatpush.msra.mxu2 %v69_v6  ;;  %v77_v17 = vld [vmem:[#allocation5 + $0x40] sm:$0xff]  ;;  %v61_v20 = vld [vmem:[#allocation2 + $0x8] sm:$0xff]  ;;  %v79_v23 = vld [vmem:[#allocation5 + $0x50] sm:$0xff] }
  0x17   :  { %804 = vmatpush.msra.mxu3 %v70_v7  ;;  %749 = vmatmul.msk.f32.vlgmr.msra.gmra.mxu0 %vm93_vm0, %v952_v8  ;;  %v65_v22 = vld [vmem:[#allocation2 + $0x28] sm:$0xff]  ;;  %v80_v24 = vld [vmem:[#allocation5 + $0x58] sm:$0xff]  ;;  %v73_v26 = vld [vmem:[#allocation5 + $0x20] sm:$0xff] }
  0x18   :  { %753 = vmatmul.msk.f32.vlgmr.msra.gmra.mxu2 %vm93_vm0, %v954_v9  ;;  %761 = vmatmul.msk.f32.vlgmr.msra.gmra.mxu3 %vm93_vm0, %v954_v9  ;;  %v72_v25 = vld [vmem:[#allocation5 + $0x18] sm:$0xff]  ;;  %v74_v27 = vld [vmem:[#allocation5 + $0x28] sm:$0xff]  ;;  %v62_v28 = vld [vmem:[#allocation2 + $0x10] sm:$0xff] }
  0x19   :  { %212 = vmatpush.msrb.mxu2 %v89_v10  ;;  %253 = vmatpush.msrb.mxu3 %v90_v11  ;;  %v66_v29 = vld [vmem:[#allocation2 + $0x30] sm:$0xff]  ;;  %v63_v30 = vld [vmem:[#allocation2 + $0x18] sm:$0xff]  ;;  %v1016_v33 = vld [vmem:[#allocation7] sm:$0x7] }
  0x1a   :  { %294 = vmatpush.msrb.mxu0 %v91_v12  ;;  %174 = vmatpush.msra.mxu1 %v70_v7  ;;  %v67_v31 = vld [vmem:[#allocation2 + $0x38] sm:$0xff]  ;;  %v364_v35 = vperm.slane %v1016_v33, 0 }
  0x1b   :  { %757 = vmatmul.msk.f32.vlgmr.msra.gmra.mxu1 %vm93_vm0, %v952_v8  ;;  %213 = vmatpush.msrb.mxu2 %v83_v13 }
  0x1c   :  { %335 = vmatpush.msrb.mxu1 %v92_v14  ;;  %254 = vmatpush.msrb.mxu3 %v84_v15 }
  0x1d   :  { %295 = vmatpush.msrb.mxu0 %v85_v16  ;;  %214 = vmatpush.msrb.mxu2 %v77_v17 }
  0x1e   :  { %336 = vmatpush.msrb.mxu1 %v86_v18  ;;  %255 = vmatpush.msrb.mxu3 %v78_v19 }
  0x1f   :  { %750 = vmatmul.msk.f32.gmra.mxu0 %vm93_vm0, %v61_v20  ;;  %215 = vmatpush.msrb.mxu2 %v71_v21 }
  0x20   :  { %754 = vmatmul.msk.f32.gmra.mxu2 %vm93_vm0, %v65_v22  ;;  %762 = vmatmul.msk.f32.gmra.mxu3 %vm93_vm0, %v65_v22 }
  0x21   :  { %296 = vmatpush.msrb.mxu0 %v79_v23  ;;  %337 = vmatpush.msrb.mxu1 %v80_v24 }
  0x22   :  { %256 = vmatpush.msrb.mxu3 %v72_v25 }
  0x23   :  { %758 = vmatmul.msk.f32.gmra.mxu1 %vm93_vm0, %v61_v20  ;;  %297 = vmatpush.msrb.mxu0 %v73_v26 }
  0x24   :  { %338 = vmatpush.msrb.mxu1 %v74_v27 }
  0x27   :  { %751 = vmatmul.msk.f32.gmra.mxu0 %vm93_vm0, %v62_v28 }
  0x28   :  { %755 = vmatmul.msk.f32.gmra.mxu2 %vm93_vm0, %v66_v29  ;;  %763 = vmatmul.msk.f32.gmra.mxu3 %vm93_vm0, %v66_v29 }
  0x2b   :  { %759 = vmatmul.msk.f32.gmra.mxu1 %vm93_vm0, %v62_v28 }
  0x2f   :  { %752 = vmatmul.msk.f32.gmra.mxu0 %vm93_vm0, %v63_v30 }
  0x30   :  { %756 = vmatmul.msk.f32.gmra.mxu2 %vm93_vm0, %v67_v31  ;;  %764 = vmatmul.msk.f32.gmra.mxu3 %vm93_vm0, %v67_v31 }
  0x33   :  { %760 = vmatmul.msk.f32.gmra.mxu1 %vm93_vm0, %v63_v30 }
  0x37   :  { %781 = vmatmul.msk.f32.vlgmr.msrb.gmra.mxu0 %vm93_vm0, %v952_v8 }
  0x38   :  { %765 = vmatmul.msk.f32.vlgmr.msrb.gmra.mxu2 %vm93_vm0, %v952_v8  ;;  %773 = vmatmul.msk.f32.vlgmr.msrb.gmra.mxu3 %vm93_vm0, %v952_v8 }
  0x3b   :  { %789 = vmatmul.msk.f32.vlgmr.msrb.gmra.mxu1 %vm93_vm0, %v952_v8 }
  0x3f   :  { %782 = vmatmul.msk.f32.gmra.mxu0 %vm93_vm0, %v61_v20 }
  0x40   :  { %766 = vmatmul.msk.f32.gmra.mxu2 %vm93_vm0, %v61_v20  ;;  %774 = vmatmul.msk.f32.gmra.mxu3 %vm93_vm0, %v61_v20 }
  0x43   :  { %790 = vmatmul.msk.f32.gmra.mxu1 %vm93_vm0, %v61_v20 }
  0x47   :  { %783 = vmatmul.msk.f32.gmra.mxu0 %vm93_vm0, %v62_v28 }
  0x48   :  { %767 = vmatmul.msk.f32.gmra.mxu2 %vm93_vm0, %v62_v28  ;;  %775 = vmatmul.msk.f32.gmra.mxu3 %vm93_vm0, %v62_v28 }
  0x4b   :  { %791 = vmatmul.msk.f32.gmra.mxu1 %vm93_vm0, %v62_v28 }
  0x4f   :  { %784 = vmatmul.msk.f32.gmra.mxu0 %vm93_vm0, %v63_v30 }
  0x50   :  { %768 = vmatmul.msk.f32.gmra.mxu2 %vm93_vm0, %v63_v30  ;;  %776 = vmatmul.msk.f32.gmra.mxu3 %vm93_vm0, %v63_v30 }
  0x53   :  { %792 = vmatmul.msk.f32.gmra.mxu1 %vm93_vm0, %v63_v30 }
  0x57   :  { %785 = vmatmul.msk.f32.gmra.mxu0 %vm93_vm0, %v954_v9 }
  0x58   :  { %769 = vmatmul.msk.f32.gmra.mxu2 %vm93_vm0, %v954_v9  ;;  %777 = vmatmul.msk.f32.gmra.mxu3 %vm93_vm0, %v954_v9 }
  0x5b   :  { %793 = vmatmul.msk.f32.gmra.mxu1 %vm93_vm0, %v954_v9 }
  0x5f   :  { %786 = vmatmul.msk.f32.gmra.mxu0 %vm93_vm0, %v65_v22 }
  0x60   :  { %770 = vmatmul.msk.f32.gmra.mxu2 %vm93_vm0, %v65_v22  ;;  %778 = vmatmul.msk.f32.gmra.mxu3 %vm93_vm0, %v65_v22 }
  0x63   :  { %794 = vmatmul.msk.f32.gmra.mxu1 %vm93_vm0, %v65_v22 }
  0x67   :  { %787 = vmatmul.msk.f32.gmra.mxu0 %vm93_vm0, %v66_v29 }
  0x68   :  { %771 = vmatmul.msk.f32.gmra.mxu2 %vm93_vm0, %v66_v29  ;;  %779 = vmatmul.msk.f32.gmra.mxu3 %vm93_vm0, %v66_v29 }
  0x6b   :  { %795 = vmatmul.msk.f32.gmra.mxu1 %vm93_vm0, %v66_v29 }
  0x6f   :  { %788 = vmatmul.msk.f32.gmra.mxu0 %vm93_vm0, %v67_v31 }
  0x70   :  { %772 = vmatmul.msk.f32.gmra.mxu2 %vm93_vm0, %v67_v31  ;;  %780 = vmatmul.msk.f32.gmra.mxu3 %vm93_vm0, %v67_v31 }
  0x73   :  { %796 = vmatmul.msk.f32.gmra.mxu1 %vm93_vm0, %v67_v31 }
  0x94   :  { %v135_v32 = vpop.f32.mrf.mxu0 }
  0x95   :  { %v365_v39 = vadd.f32 %v364_v35, %v135_v32 }
  0x97   :  { %v373_v44 = vmax.f32 %v365_v39, 0.0 }
  0x98   :  { %v1018_v34 = vpop.f32.mrf.mxu1 }
  0x99   :  { %v381_v51 = vrot.slane %v373_v44, 4 }
  0x9b   :  { %v147_v36 = vpop.f32.mrf.mxu2  ;;  %v1021_v37 = vpop.f32.mrf.mxu3  ;;  %v382_v58 = vmax.f32 %v373_v44, %v381_v51 }
  0x9c   :  { %v138_v38 = vpop.f32.mrf.mxu0  ;;  %v369_v41 = vadd.f32 %v364_v35, %v147_v36 }
  0x9d   :  { %v366_v40 = vadd.f32 %v364_v35, %v138_v38  ;;  %v383_v4 = vrot.slane %v382_v58, 2 }
  0x9e   :  { %v377_v45 = vmax.f32 %v369_v41, 0.0 }
  0x9f   :  { %v374_v42 = vmax.f32 %v366_v40, 0.0  ;;  %v384_v15 = vmax.f32 %v382_v58, %v383_v4 }
  0xa0   :  { %v1023_v43 = vpop.f32.mrf.mxu1  ;;  %v405_v54 = vrot.slane %v377_v45, 4 }
  0xa1   :  { %v387_v46 = vrot.slane %v374_v42, 4  ;;  %v385_v27 = vrot.slane %v384_v15, 1 }
  0xa2   :  { %v406_v61 = vmax.f32 %v377_v45, %v405_v54 }
  0xa3   :  { %v150_v47 = vpop.f32.mrf.mxu2  ;;  %v1025_v48 = vpop.f32.mrf.mxu3  ;;  %v388_v55 = vmax.f32 %v374_v42, %v387_v46  ;;  %v386_v44 = vmax.f32 %v384_v15, %v385_v27 }
  0xa4   :  { %v370_v49 = vadd.f32 %v364_v35, %v150_v47  ;;  %v141_v50 = vpop.f32.mrf.mxu0  ;;  %v407_v9 = vrot.slane %v406_v61, 2 }
  0xa5   :  { %v367_v52 = vadd.f32 %v364_v35, %v141_v50  ;;  %v389_v62 = vrot.slane %v388_v55, 2 }
  0xa6   :  { %v378_v53 = vmax.f32 %v370_v49, 0.0  ;;  %v408_v19 = vmax.f32 %v406_v61, %v407_v9  ;;  %v1036_v49 = vperm.slane %v1016_v33, 1 }
  0xa7   :  { %v375_v56 = vmax.f32 %v367_v52, 0.0  ;;  %v390_v10 = vmax.f32 %v388_v55, %v389_v62 }
  0xa8   :  { %v1027_v57 = vpop.f32.mrf.mxu1  ;;  %v411_v59 = vrot.slane %v378_v53, 4  ;;  %v409_v32 = vrot.slane %v408_v19, 1 }
  0xa9   :  { %v393_v60 = vrot.slane %v375_v56, 4  ;;  %v391_v20 = vrot.slane %v390_v10, 1 }
  0xaa   :  { %v412_v5 = vmax.f32 %v378_v53, %v411_v59  ;;  %v410_v51 = vmax.f32 %v408_v19, %v409_v32 }
  0xab   :  { %v394_v63 = vmax.f32 %v375_v56, %v393_v60  ;;  %v153_v0 = vpop.f32.mrf.mxu2  ;;  %v1029_v1 = vpop.f32.mrf.mxu3  ;;  %v392_v36 = vmax.f32 %v390_v10, %v391_v20  ;;  %v1040_v56 = vperm.slane %v1016_v33, 2 }
  0xac   :  { %v371_v2 = vadd.f32 %v364_v35, %v153_v0  ;;  %v144_v3 = vpop.f32.mrf.mxu0  ;;  %v413_v16 = vrot.slane %v412_v5, 2 }
  0xad   :  { %v395_v6 = vrot.slane %v394_v63, 2  ;;  %v368_v7 = vadd.f32 %v364_v35, %v144_v3  ;;  %v682_v52 = vsel %vm681_vm1, %v392_v36, %v386_v44 }
  0xae   :  { %v379_v8 = vmax.f32 %v371_v2, 0.0  ;;  %v414_v28 = vmax.f32 %v412_v5, %v413_v16 }
  0xaf   :  { %v376_v11 = vmax.f32 %v368_v7, 0.0  ;;  %v396_v12 = vmax.f32 %v394_v63, %v395_v6 }
  0xb0   :  { %v417_v13 = vrot.slane %v379_v8, 4  ;;  %v1031_v14 = vpop.f32.mrf.mxu1  ;;  %v415_v45 = vrot.slane %v414_v28, 1 }
  0xb1   :  { %v399_v17 = vrot.slane %v376_v11, 4  ;;  %v397_v24 = vrot.slane %v396_v12, 1 }
  0xb2   :  { %v418_v18 = vmax.f32 %v379_v8, %v417_v13  ;;  %v416_v63 = vmax.f32 %v414_v28, %v415_v45 }
  0xb3   :  { %v400_v21 = vmax.f32 %v376_v11, %v399_v17  ;;  %v156_v22 = vpop.f32.mrf.mxu2  ;;  %v1033_v23 = vpop.f32.mrf.mxu3  ;;  %v398_v39 = vmax.f32 %v396_v12, %v397_v24 }
  0xb4   :  { %v372_v25 = vadd.f32 %v364_v35, %v156_v22  ;;  %v299_v26 = vpop.f32.mrf.mxu0  ;;  %v419_v29 = vrot.slane %v418_v18, 2 }
  0xb5   :  { %v401_v30 = vrot.slane %v400_v21, 2  ;;  %v543_v41 = vrot.slane %v299_v26, 1  ;;  %v684_v58 = vsel %vm683_vm2, %v398_v39, %v682_v52 }
  0xb6   :  { %v380_v31 = vmax.f32 %v372_v25, 0.0  ;;  %v420_v46 = vmax.f32 %v418_v18, %v419_v29 }
  0xb7   :  { %v402_v38 = vmax.f32 %v400_v21, %v401_v30 }
  0xb8   :  { %v423_v40 = vrot.slane %v380_v31, 4  ;;  %v340_v42 = vpop.f32.mrf.mxu1  ;;  %v421_v0 = vrot.slane %v420_v46, 1 }
  0xb9   :  { %v403_v35 = vrot.slane %v402_v38, 1  ;;  %v575_v50 = vrot.slane %v340_v42, 2 }
  0xba   :  { %v424_v47 = vmax.f32 %v380_v31, %v423_v40  ;;  %v422_v12 = vmax.f32 %v420_v46, %v421_v0 }
  0xbb   :  { %v404_v53 = vmax.f32 %v402_v38, %v403_v35  ;;  %v217_v54 = vpop.f32.mrf.mxu2  ;;  %v258_v55 = vpop.f32.mrf.mxu3 }
  0xbc   :  { %v425_v59 = vrot.slane %v424_v47, 2  ;;  %v437_v60 = vrot.slane %v217_v54, 1  ;;  %v559_v61 = vadd.f32 %v543_v41, %v258_v55  ;;  %v302_v62 = vpop.f32.mrf.mxu0 }
  0xbd   :  { %v686_v2 = vsel %vm685_vm3, %v404_v53, %v684_v58  ;;  %v544_v7 = vrot.slane %v302_v62, 1 }
  0xbe   :  { %v688_v3 = vsel %vm687_vm4, %v410_v51, %v686_v2  ;;  %v426_v4 = vmax.f32 %v424_v47, %v425_v59  ;;  %v453_v5 = vadd.f32 %v437_v60, %v1018_v34  ;;  %v591_v6 = vadd.f32 %v575_v50, %v559_v61 }
  0xbf   :  { %v690_v11 = vsel %vm689_vm5, %v416_v63, %v688_v3 }
  0xc0   :  { %v427_v33 = vrot.slane %v426_v4, 1  ;;  %v462_v8 = vadd.f32 %v1036_v49, %v453_v5  ;;  %v600_v9 = vadd.f32 %v1040_v56, %v591_v6  ;;  %v343_v10 = vpop.f32.mrf.mxu1  ;;  %v692_v19 = vsel %vm691_vm6, %v422_v12, %v690_v11 }
  0xc1   :  { %v576_v17 = vrot.slane %v343_v10, 2 }
  0xc2   :  { %v428_v13 = vmax.f32 %v426_v4, %v427_v33  ;;  %v470_v15 = vmax.f32 %v462_v8, 0.0  ;;  %v608_v16 = vmax.f32 %v600_v9, 0.0 }
  0xc3   :  { %v220_v34 = vpop.f32.mrf.mxu2  ;;  %v261_v18 = vpop.f32.mrf.mxu3 }
  0xc4   :  { %v479_v20 = vsel %vm478_vm7, %v470_v15, -inf  ;;  %v617_v21 = vsel %vm616_vm8, %v608_v16, -inf  ;;  %v438_v22 = vrot.slane %v220_v34, 1  ;;  %v560_v24 = vadd.f32 %v544_v7, %v261_v18  ;;  %v305_v25 = vpop.f32.mrf.mxu0 }
  0xc5   :  { %v480_v26 = vrot.slane %v479_v20, 4  ;;  %v618_v27 = vrot.slane %v617_v21, 4  ;;  %v694_v28 = vsel %vm693_vm9, %v428_v13, %v692_v19  ;;  %v545_v39 = vrot.slane %v305_v25, 1 }
  0xc6   :  { %v454_v29 = vadd.f32 %v438_v22, %v1023_v43  ;;  %v592_v30 = vadd.f32 %v576_v17, %v560_v24  ;;  %728 = vst [vmem:[#allocation8] sm:$0xff] %v694_v28 }
  0xc7   :  { %v481_v31 = vmax.f32 %v479_v20, %v480_v26  ;;  %v619_v32 = vmax.f32 %v617_v21, %v618_v27 }
  0xc8   :  { %v463_v36 = vadd.f32 %v1036_v49, %v454_v29  ;;  %v601_v38 = vadd.f32 %v1040_v56, %v592_v30  ;;  %v346_v40 = vpop.f32.mrf.mxu1 }
  0xc9   :  { %v482_v41 = vrot.slane %v481_v31, 2  ;;  %v620_v42 = vrot.slane %v619_v32, 2  ;;  %v577_v46 = vrot.slane %v346_v40, 2 }
  0xca   :  { %v471_v44 = vmax.f32 %v463_v36, 0.0  ;;  %v609_v45 = vmax.f32 %v601_v38, 0.0 }
  0xcb   :  { %v223_v35 = vpop.f32.mrf.mxu2  ;;  %v264_v47 = vpop.f32.mrf.mxu3  ;;  %v483_v54 = vmax.f32 %v481_v31, %v482_v41  ;;  %v621_v59 = vmax.f32 %v619_v32, %v620_v42 }
  0xcc   :  { %v486_v50 = vsel %vm478_vm7, %v471_v44, -inf  ;;  %v624_v43 = vsel %vm616_vm8, %v609_v45, -inf  ;;  %v439_v51 = vrot.slane %v223_v35, 1  ;;  %v561_v52 = vadd.f32 %v545_v39, %v264_v47  ;;  %v308_v53 = vpop.f32.mrf.mxu0 }
  0xcd   :  { %v487_v55 = vrot.slane %v486_v50, 4  ;;  %v625_v58 = vrot.slane %v624_v43, 4  ;;  %v546_v3 = vrot.slane %v308_v53, 1  ;;  %v484_v5 = vrot.slane %v483_v54, 1 }
  0xce   :  { %v455_v60 = vadd.f32 %v439_v51, %v1027_v57  ;;  %v593_v61 = vadd.f32 %v577_v46, %v561_v52  ;;  %v622_v33 = vrot.slane %v621_v59, 1 }
  0xcf   :  { %v488_v62 = vmax.f32 %v486_v50, %v487_v55  ;;  %v626_v63 = vmax.f32 %v624_v43, %v625_v58  ;;  %v485_v24 = vmax.f32 %v483_v54, %v484_v5 }
  0xd0   :  { %v464_v0 = vadd.f32 %v1036_v49, %v455_v60  ;;  %v602_v2 = vadd.f32 %v1040_v56, %v593_v61  ;;  %v349_v4 = vpop.f32.mrf.mxu1  ;;  %v623_v25 = vmax.f32 %v621_v59, %v622_v33 }
  0xd1   :  { %v489_v6 = vrot.slane %v488_v62, 2  ;;  %v627_v7 = vrot.slane %v626_v63, 2  ;;  %v578_v10 = vrot.slane %v349_v4, 2 }
  0xd2   :  { %v472_v8 = vmax.f32 %v464_v0, 0.0  ;;  %v610_v9 = vmax.f32 %v602_v2, 0.0 }
  0xd3   :  { %v490_v11 = vmax.f32 %v488_v62, %v489_v6  ;;  %v628_v12 = vmax.f32 %v626_v63, %v627_v7  ;;  %v226_v13 = vpop.f32.mrf.mxu2  ;;  %v267_v57 = vpop.f32.mrf.mxu3 }
  0xd4   :  { %v493_v15 = vsel %vm478_vm7, %v472_v8, -inf  ;;  %v631_v16 = vsel %vm616_vm8, %v610_v9, -inf  ;;  %v440_v17 = vrot.slane %v226_v13, 1  ;;  %v562_v34 = vadd.f32 %v546_v3, %v267_v57  ;;  %v311_v18 = vpop.f32.mrf.mxu0 }
  0xd5   :  { %v491_v19 = vrot.slane %v490_v11, 1  ;;  %v629_v20 = vrot.slane %v628_v12, 1  ;;  %v494_v21 = vrot.slane %v493_v15, 4  ;;  %v632_v22 = vrot.slane %v631_v16, 4 }
  0xd6   :  { %v456_v26 = vadd.f32 %v440_v17, %v1031_v14  ;;  %v594_v27 = vadd.f32 %v578_v10, %v562_v34  ;;  %v547_v38 = vrot.slane %v311_v18, 1 }
  0xd7   :  { %v492_v28 = vmax.f32 %v490_v11, %v491_v19  ;;  %v630_v29 = vmax.f32 %v628_v12, %v629_v20  ;;  %v495_v30 = vmax.f32 %v493_v15, %v494_v21  ;;  %v633_v31 = vmax.f32 %v631_v16, %v632_v22 }
  0xd8   :  { %v465_v32 = vadd.f32 %v1036_v49, %v456_v26  ;;  %v603_v36 = vadd.f32 %v1040_v56, %v594_v27  ;;  %v352_v39 = vpop.f32.mrf.mxu1 }
  0xd9   :  { %v704_v40 = vsel %vm681_vm1, %v492_v28, %v485_v24  ;;  %v720_v41 = vsel %vm681_vm1, %v630_v29, %v623_v25  ;;  %v496_v42 = vrot.slane %v495_v30, 2  ;;  %v634_v44 = vrot.slane %v633_v31, 2 }
  0xda   :  { %v473_v45 = vmax.f32 %v465_v32, 0.0  ;;  %v611_v46 = vmax.f32 %v603_v36, 0.0  ;;  %v579_v14 = vrot.slane %v352_v39, 2 }
  0xdb   :  { %v497_v35 = vmax.f32 %v495_v30, %v496_v42  ;;  %v635_v47 = vmax.f32 %v633_v31, %v634_v44  ;;  %v229_v50 = vpop.f32.mrf.mxu2  ;;  %v270_v43 = vpop.f32.mrf.mxu3 }
  0xdc   :  { %v500_v51 = vsel %vm478_vm7, %v473_v45, -inf  ;;  %v638_v52 = vsel %vm616_vm8, %v611_v46, -inf  ;;  %v441_v53 = vrot.slane %v229_v50, 1  ;;  %v563_v54 = vadd.f32 %v547_v38, %v270_v43  ;;  %v314_v55 = vpop.f32.mrf.mxu0 }
  0xdd   :  { %v498_v58 = vrot.slane %v497_v35, 1  ;;  %v636_v59 = vrot.slane %v635_v47, 1  ;;  %v501_v60 = vrot.slane %v500_v51, 4  ;;  %v639_v61 = vrot.slane %v638_v52, 4 }
  0xde   :  { %v457_v62 = vadd.f32 %v441_v53, %v1021_v37  ;;  %v595_v63 = vadd.f32 %v579_v14, %v563_v54  ;;  %v548_v7 = vrot.slane %v314_v55, 1 }
  0xdf   :  { %v499_v0 = vmax.f32 %v497_v35, %v498_v58  ;;  %v637_v2 = vmax.f32 %v635_v47, %v636_v59  ;;  %v502_v3 = vmax.f32 %v500_v51, %v501_v60  ;;  %v640_v4 = vmax.f32 %v638_v52, %v639_v61 }
  0xe0   :  { %v466_v5 = vadd.f32 %v1036_v49, %v457_v62  ;;  %v604_v6 = vadd.f32 %v1040_v56, %v595_v63  ;;  %v355_v33 = vpop.f32.mrf.mxu1 }
  0xe1   :  { %v705_v8 = vsel %vm683_vm2, %v499_v0, %v704_v40  ;;  %v721_v9 = vsel %vm683_vm2, %v637_v2, %v720_v41  ;;  %v503_v10 = vrot.slane %v502_v3, 2  ;;  %v641_v11 = vrot.slane %v640_v4, 2 }
  0xe2   :  { %v474_v12 = vmax.f32 %v466_v5, 0.0  ;;  %v612_v13 = vmax.f32 %v604_v6, 0.0  ;;  %v580_v37 = vrot.slane %v355_v33, 2 }
  0xe3   :  { %v504_v57 = vmax.f32 %v502_v3, %v503_v10  ;;  %v642_v15 = vmax.f32 %v640_v4, %v641_v11  ;;  %v232_v16 = vpop.f32.mrf.mxu2  ;;  %v273_v17 = vpop.f32.mrf.mxu3 }
  0xe4   :  { %v507_v34 = vsel %vm478_vm7, %v474_v12, -inf  ;;  %v645_v18 = vsel %vm616_vm8, %v612_v13, -inf  ;;  %v442_v19 = vrot.slane %v232_v16, 1  ;;  %v564_v20 = vadd.f32 %v548_v7, %v273_v17  ;;  %v317_v21 = vpop.f32.mrf.mxu0 }
  0xe5   :  { %v505_v22 = vrot.slane %v504_v57, 1  ;;  %v643_v24 = vrot.slane %v642_v15, 1  ;;  %v508_v25 = vrot.slane %v507_v34, 4  ;;  %v646_v26 = vrot.slane %v645_v18, 4 }
  0xe6   :  { %v458_v27 = vadd.f32 %v442_v19, %v1025_v48  ;;  %v596_v28 = vadd.f32 %v580_v37, %v564_v20  ;;  %v549_v39 = vrot.slane %v317_v21, 1 }
  0xe7   :  { %v506_v29 = vmax.f32 %v504_v57, %v505_v22  ;;  %v644_v30 = vmax.f32 %v642_v15, %v643_v24  ;;  %v509_v31 = vmax.f32 %v507_v34, %v508_v25  ;;  %v647_v32 = vmax.f32 %v645_v18, %v646_v26 }
  0xe8   :  { %v467_v36 = vadd.f32 %v1036_v49, %v458_v27  ;;  %v605_v38 = vadd.f32 %v1040_v56, %v596_v28  ;;  %v358_v40 = vpop.f32.mrf.mxu1 }
  0xe9   :  { %v706_v41 = vsel %vm685_vm3, %v506_v29, %v705_v8  ;;  %v722_v42 = vsel %vm685_vm3, %v644_v30, %v721_v9  ;;  %v510_v44 = vrot.slane %v509_v31, 2  ;;  %v648_v45 = vrot.slane %v647_v32, 2 }
  0xea   :  { %v475_v46 = vmax.f32 %v467_v36, 0.0  ;;  %v613_v14 = vmax.f32 %v605_v38, 0.0  ;;  %v581_v48 = vrot.slane %v358_v40, 2 }
  0xeb   :  { %v511_v35 = vmax.f32 %v509_v31, %v510_v44  ;;  %v649_v47 = vmax.f32 %v647_v32, %v648_v45  ;;  %v235_v50 = vpop.f32.mrf.mxu2  ;;  %v276_v43 = vpop.f32.mrf.mxu3 }
  0xec   :  { %v514_v51 = vsel %vm478_vm7, %v475_v46, -inf  ;;  %v652_v52 = vsel %vm616_vm8, %v613_v14, -inf  ;;  %v443_v53 = vrot.slane %v235_v50, 1  ;;  %v565_v54 = vadd.f32 %v549_v39, %v276_v43  ;;  %v320_v61 = vpop.f32.mrf.mxu0 }
  0xed   :  { %v512_v55 = vrot.slane %v511_v35, 1  ;;  %v650_v58 = vrot.slane %v649_v47, 1  ;;  %v515_v59 = vrot.slane %v514_v51, 4  ;;  %v653_v60 = vrot.slane %v652_v52, 4 }
  0xee   :  { %v459_v62 = vadd.f32 %v443_v53, %v1029_v1  ;;  %v597_v63 = vadd.f32 %v581_v48, %v565_v54  ;;  %v550_v7 = vrot.slane %v320_v61, 1 }
  0xef   :  { %v513_v0 = vmax.f32 %v511_v35, %v512_v55  ;;  %v651_v2 = vmax.f32 %v649_v47, %v650_v58  ;;  %v516_v3 = vmax.f32 %v514_v51, %v515_v59  ;;  %v654_v4 = vmax.f32 %v652_v52, %v653_v60 }
  0xf0   :  { %v468_v5 = vadd.f32 %v1036_v49, %v459_v62  ;;  %v606_v6 = vadd.f32 %v1040_v56, %v597_v63  ;;  %v361_v33 = vpop.f32.mrf.mxu1 }
  0xf1   :  { %v517_v8 = vrot.slane %v516_v3, 2  ;;  %v655_v9 = vrot.slane %v654_v4, 2  ;;  %v707_v10 = vsel %vm687_vm4, %v513_v0, %v706_v41  ;;  %v582_v13 = vrot.slane %v361_v33, 2 }
  0xf2   :  { %v476_v11 = vmax.f32 %v468_v5, 0.0  ;;  %v614_v12 = vmax.f32 %v606_v6, 0.0  ;;  %v723_v1 = vsel %vm687_vm4, %v651_v2, %v722_v42 }
  0xf3   :  { %v518_v37 = vmax.f32 %v516_v3, %v517_v8  ;;  %v656_v57 = vmax.f32 %v654_v4, %v655_v9  ;;  %v238_v15 = vpop.f32.mrf.mxu2  ;;  %v279_v16 = vpop.f32.mrf.mxu3 }
  0xf4   :  { %v521_v17 = vsel %vm478_vm7, %v476_v11, -inf  ;;  %v659_v34 = vsel %vm616_vm8, %v614_v12, -inf  ;;  %v444_v18 = vrot.slane %v238_v15, 1  ;;  %v566_v19 = vadd.f32 %v550_v7, %v279_v16 }
  0xf5   :  { %v519_v20 = vrot.slane %v518_v37, 1  ;;  %v657_v21 = vrot.slane %v656_v57, 1  ;;  %v522_v22 = vrot.slane %v521_v17, 4  ;;  %v660_v24 = vrot.slane %v659_v34, 4 }
  0xf6   :  { %v460_v25 = vadd.f32 %v444_v18, %v1033_v23  ;;  %v598_v26 = vadd.f32 %v582_v13, %v566_v19 }
  0xf7   :  { %v520_v27 = vmax.f32 %v518_v37, %v519_v20  ;;  %v658_v28 = vmax.f32 %v656_v57, %v657_v21  ;;  %v523_v29 = vmax.f32 %v521_v17, %v522_v22  ;;  %v661_v30 = vmax.f32 %v659_v34, %v660_v24 }
  0xf8   :  { %v469_v31 = vadd.f32 %v1036_v49, %v460_v25  ;;  %v607_v32 = vadd.f32 %v1040_v56, %v598_v26 }
  0xf9   :  { %v524_v36 = vrot.slane %v523_v29, 2  ;;  %v662_v38 = vrot.slane %v661_v30, 2  ;;  %v708_v39 = vsel %vm689_vm5, %v520_v27, %v707_v10  ;;  %v724_v40 = vsel %vm689_vm5, %v658_v28, %v723_v1 }
  0xfa   :  { %v477_v41 = vmax.f32 %v469_v31, 0.0  ;;  %v615_v42 = vmax.f32 %v607_v32, 0.0 }
  0xfb   :  { %v525_v44 = vmax.f32 %v523_v29, %v524_v36  ;;  %v663_v45 = vmax.f32 %v661_v30, %v662_v38 }
  0xfc   :  { %v528_v23 = vsel %vm478_vm7, %v477_v41, -inf  ;;  %v666_v46 = vsel %vm616_vm8, %v615_v42, -inf }
  0xfd   :  { %v526_v14 = vrot.slane %v525_v44, 1  ;;  %v664_v48 = vrot.slane %v663_v45, 1  ;;  %v529_v35 = vrot.slane %v528_v23, 4  ;;  %v667_v49 = vrot.slane %v666_v46, 4 }
  0xff   :  { %v527_v47 = vmax.f32 %v525_v44, %v526_v14  ;;  %v665_v56 = vmax.f32 %v663_v45, %v664_v48  ;;  %v530_v50 = vmax.f32 %v528_v23, %v529_v35  ;;  %v668_v43 = vmax.f32 %v666_v46, %v667_v49 }
 0x101   :  { %v531_v51 = vrot.slane %v530_v50, 2  ;;  %v669_v52 = vrot.slane %v668_v43, 2  ;;  %v709_v53 = vsel %vm691_vm6, %v527_v47, %v708_v39  ;;  %v725_v54 = vsel %vm691_vm6, %v665_v56, %v724_v40 }
 0x103   :  { %v532_v55 = vmax.f32 %v530_v50, %v531_v51  ;;  %v670_v58 = vmax.f32 %v668_v43, %v669_v52 }
 0x105   :  { %v533_v59 = vrot.slane %v532_v55, 1  ;;  %v671_v60 = vrot.slane %v670_v58, 1 }
 0x107   :  { %v534_v61 = vmax.f32 %v532_v55, %v533_v59  ;;  %v672_v62 = vmax.f32 %v670_v58, %v671_v60 }
 0x109   :  { %v710_v63 = vsel %vm693_vm9, %v534_v61, %v709_v53  ;;  %v726_v0 = vsel %vm693_vm9, %v672_v62, %v725_v54 }
 0x10a   :  { %729 = vst [vmem:[#allocation8 + $0x8] sm:$0xff] %v710_v63 }
 0x10b   :  { %730 = vst [vmem:[#allocation8 + $0x10] sm:$0xff] %v726_v0 }
 0x10c   :  { %741 = dma.vmem_to_hbm [thread:$0]  %s737_s2, 384, %s739_s5, [#allocation4]  }
 0x10d   :  { %913 = dma.done.wait [#allocation4], 384  }
 0x10e   :  { %914 = vsyncadd [#allocation4], 4294966912 }
 0x10f   :  { %746 = vsyncpa [#allocation3], 1 }
 0x110   :  { %747 = vsyncpa [#allocation6], 1 }
 0x111   :  { %748 = vsyncpa [#allocation4], 1 }

</bundles_post_ra>
